<compile_context>
chip_gen: v7x
topology: tpu7x:2x2x1
jax: 0.10.0
libtpu: 0.0.40
codegen_flags: <defaults>
</compile_context>

<pallas_src>
import functools

import jax
import jax.numpy as jnp
from jax.experimental import pallas as pl
from jax.experimental.pallas import tpu as pltpu


def _multi_supcon_kernel(cfq_ref, cfk_ref, wa_ref, sw_ref, sm_ref, out_ref,
                         m_acc, z_acc, *, inv_temp, loss_scale):
    qi = pl.program_id(0)
    ki = pl.program_id(1)
    nk = pl.num_programs(1)

    @pl.when(ki == 0)
    def _init():
        m_acc[...] = jnp.full_like(m_acc, -jnp.inf)
        z_acc[...] = jnp.zeros_like(z_acc)

    # anchor . contrast logits for this tile pair: bf16 MXU matmul with f32
    # accumulation, scaled by the host-precomputed 1/(temperature + 1e-8).
    adc = jax.lax.dot_general(
        cfq_ref[...], cfk_ref[...], (((1,), (1,)), ((), ())),
        preferred_element_type=jnp.float32) * inv_temp            # [bq, bk]
    bq, bk = adc.shape

    # Online (flash-style) row max / exp-sum.  The row max runs over the full
    # row (incl. self-contrast), matching torch; the exp-sum excludes the
    # global diagonal.  The iota/select diagonal mask is only paid on tiles
    # that actually intersect the global diagonal.
    m_prev = m_acc[...]
    m_new = jnp.maximum(m_prev, jnp.max(adc, axis=1, keepdims=True))
    e = jnp.exp(adc - m_new)
    rescale = jnp.exp(m_prev - m_new)

    row0 = qi * bq
    col0 = ki * bk
    intersects_diag = jnp.logical_and(row0 < col0 + bk, col0 < row0 + bq)

    @pl.when(intersects_diag)
    def _update_diag_tile():
        ri = jax.lax.broadcasted_iota(jnp.int32, (bq, bk), 0)
        ci = jax.lax.broadcasted_iota(jnp.int32, (bq, bk), 1)
        not_diag = (ri + row0) != (ci + col0)
        e_sum = jnp.sum(jnp.where(not_diag, e, 0.0), axis=1, keepdims=True)
        z_acc[...] = rescale * z_acc[...] + e_sum

    @pl.when(jnp.logical_not(intersects_diag))
    def _update_offdiag_tile():
        z_acc[...] = rescale * z_acc[...] + jnp.sum(e, axis=1, keepdims=True)

    m_acc[...] = m_new

    @pl.when(ki == nk - 1)
    def _finalize():
        # log softmax denominator in the final-row-max shifted scale, matching
        # torch's log(exp_logits.sum(1) + 1e-8).
        log_denom = m_acc[...] + jnp.log(z_acc[...] + 1e-8)
        # sum_j w_ij * log_prob_ij = wa_i - log_denom_i * sum_j w_ij
        numer = wa_ref[...] - log_denom * sw_ref[...]
        mean_pos = numer * pl.reciprocal(sm_ref[...] + 1e-8, approx=True)
        out_ref[...] = loss_scale * mean_pos                      # [bq, 1]


def _pick_block(n, pref, align):
    """Largest multiple of `align` that divides n and is <= pref; else n."""
    b = min(pref, n)
    b -= b % align
    while b >= align:
        if n % b == 0:
            return b
        b -= align
    return n


def multi_supcon_loss(features, labels, *, temperature=0.07,
                      base_temperature=0.07, c_threshold=0.3,
                      contrast_mode="all", block_q=256, block_k=1024):
    """features: [B, V, D] float32, labels: [B, L] binary multi-hot."""
    assert contrast_mode == "all", "only contrast_mode='all' implemented"
    B, V, D = features.shape
    N = V * B
    inv_temp = 1.0 / (float(temperature) + 1e-8)
    loss_scale = -(float(temperature) / float(base_temperature))

    # contrast_feature = cat(unbind(features, 1), 0): view-major [N, D];
    # row i corresponds to batch index i mod B.
    cf = jnp.transpose(features, (1, 0, 2)).reshape(N, D)
    cf_bf16 = cf.astype(jnp.bfloat16)

    # Jaccard similarity at [B, B] via one matmul (exact for binary multi-hot
    # labels: sum(min(a,b)) == a.b, sum(max(a,b)) == |a|+|b|-a.b).
    lab = labels.astype(jnp.float32)
    upper = lab @ lab.T
    rowsum = jnp.sum(lab, axis=1)
    lower = rowsum[:, None] + rowsum[None, :] - upper
    multi = upper / (lower + 1e-8)
    maskb = (multi >= c_threshold).astype(jnp.float32)
    w = maskb * multi                                 # fused mask * jaccard

    # Algebraic elimination of the N x N positive-weight stream:
    #   sum_j w_t[i,j]*adc[i,j]
    #     = inv_temp * ( cf_i . (w @ S)[i mod B]  -  w[b,b] * (cf_i . cf_i) )
    # with S = sum over views ([B, D]); exact diagonal correction, no
    # unit-norm assumption.  All f32, all tiny vs. the old N x N stream.
    S = jnp.sum(features, axis=1).astype(jnp.float32)             # [B, D]
    P = w @ S                                                     # [B, D]
    P_t = jnp.tile(P, (V, 1))                                     # [N, D]
    w_diag_t = jnp.tile(jnp.diagonal(w), (V,))                    # [N]
    cf_sq = jnp.sum(cf * cf, axis=1)                              # [N]
    wa = inv_temp * (jnp.sum(cf * P_t, axis=1) - w_diag_t * cf_sq)
    wa = wa[:, None]                                              # [N, 1]

    # Per-anchor-row sums of the (diagonal-masked, V x V tiled) mask / weight —
    # feature independent, computed at [B] and tiled to [N].
    sum_w_b = V * jnp.sum(w, axis=1) - jnp.diagonal(w)
    sum_m_b = V * jnp.sum(maskb, axis=1) - jnp.diagonal(maskb)
    sum_w = jnp.tile(sum_w_b, (V,))[:, None]                      # [N, 1]
    sum_m = jnp.tile(sum_m_b, (V,))[:, None]                      # [N, 1]

    bq = _pick_block(N, block_q, 16)    # bf16 sublane packing for anchor tiles
    bk = _pick_block(N, block_k, 128)   # lane width of the streamed tiles
    grid = (N // bq, N // bk)

    kernel = functools.partial(_multi_supcon_kernel,
                               inv_temp=inv_temp, loss_scale=loss_scale)

    per_row_loss = pl.pallas_call(
        kernel,
        out_shape=jax.ShapeDtypeStruct((N, 1), jnp.float32),
        grid_spec=pltpu.PrefetchScalarGridSpec(
            num_scalar_prefetch=0,
            grid=grid,
            in_specs=[
                pl.BlockSpec((bq, D), lambda qi, ki: (qi, 0)),    # anchor rows
                pl.BlockSpec((bk, D), lambda qi, ki: (ki, 0)),    # contrast rows
                pl.BlockSpec((bq, 1), lambda qi, ki: (qi, 0)),    # wa (precomputed)
                pl.BlockSpec((bq, 1), lambda qi, ki: (qi, 0)),    # sum(weights)
                pl.BlockSpec((bq, 1), lambda qi, ki: (qi, 0)),    # sum(mask)
            ],
            out_specs=pl.BlockSpec((bq, 1), lambda qi, ki: (qi, 0)),
            scratch_shapes=[pltpu.VMEM((bq, 1), jnp.float32)] * 2,
        ),
        compiler_params=pltpu.CompilerParams(
            dimension_semantics=("parallel", "arbitrary")),
    )(cf_bf16, cf_bf16, wa, sum_w, sum_m)

    # loss.view(anchor_count, batch).mean() == mean over all N anchor rows.
    return jnp.mean(per_row_loss)


def _reference_loss(features, labels, temperature=0.07, base_temperature=0.07,
                    c_threshold=0.3):
    """Pure-JAX f32 reference mirroring the PyTorch forward (for validation)."""
    B, V, D = features.shape
    N = V * B
    cf = jnp.transpose(features, (1, 0, 2)).reshape(N, D)
    lab = labels.astype(jnp.float32)
    upper = jnp.sum(jnp.minimum(lab[:, None, :], lab[None, :, :]), axis=-1)
    lower = jnp.sum(jnp.maximum(lab[:, None, :], lab[None, :, :]), axis=-1)
    multi = upper / (lower + 1e-8)
    mask = (multi >= c_threshold).astype(jnp.float32)
    adc = cf @ cf.T / (temperature + 1e-8)
    logits = adc - jnp.max(adc, axis=1, keepdims=True)
    mask_t = jnp.tile(mask, (V, V))
    multi_t = jnp.tile(multi, (V, V))
    logits_mask = 1.0 - jnp.eye(N, dtype=jnp.float32)
    mask_t = mask_t * logits_mask
    exp_logits = jnp.exp(logits) * logits_mask
    log_prob = logits - jnp.log(jnp.sum(exp_logits, 1, keepdims=True) + 1e-8)
    mean_pos = jnp.sum(mask_t * log_prob * multi_t, 1) / (jnp.sum(mask_t, 1) + 1e-8)
    loss = -(temperature / base_temperature) * mean_pos
    return jnp.mean(loss)


if __name__ == "__main__":
    key = jax.random.PRNGKey(0)

    def make_inputs(k, B, V, D, L):
        kf, kl = jax.random.split(k)
        feats = jax.random.normal(kf, (B, V, D), dtype=jnp.float32)
        feats = feats / jnp.linalg.norm(feats, axis=-1, keepdims=True)
        labels = (jax.random.uniform(kl, (B, L)) > 0.5).astype(jnp.float32)
        return feats, labels

    k1, k2 = jax.random.split(key)

    # Small config (6 label compartments as in the module); single-tile grid.
    feats, labels = make_inputs(k1, B=8, V=2, D=128, L=6)
    loss = multi_supcon_loss(feats, labels, temperature=0.07,
                             base_temperature=0.07, c_threshold=0.3)
    loss = jax.block_until_ready(loss)
    ref = _reference_loss(feats, labels)
    # bf16 MXU inputs + approx reciprocal -> compare to f32 ref with loose rtol.
    assert jnp.allclose(loss, ref, rtol=2.5e-2, atol=2e-3), (loss, ref)

    # Larger config forcing a 2 x 2 streaming grid: exercises the online-max
    # accumulation across contrast tiles and both the diagonal-intersecting
    # and non-intersecting pl.when paths.
    feats2, labels2 = make_inputs(k2, B=128, V=2, D=128, L=6)
    loss2 = multi_supcon_loss(feats2, labels2, block_q=128, block_k=128)
    loss2 = jax.block_until_ready(loss2)
    ref2 = _reference_loss(feats2, labels2)
    assert jnp.allclose(loss2, ref2, rtol=2.5e-2, atol=2e-3), (loss2, ref2)

    print("KERNEL_OK")
</pallas_src>

<mosaic_0001>
module attributes {stable_mosaic.version = 11 : i64} {
  func.func @_multi_supcon_kernel(%arg0: i32, %arg1: i32, %arg2: memref<16x128xbf16, #tpu.memory_space<vmem>>, %arg3: memref<16x128xbf16, #tpu.memory_space<vmem>>, %arg4: memref<16x1xf32, #tpu.memory_space<vmem>>, %arg5: memref<16x1xf32, #tpu.memory_space<vmem>>, %arg6: memref<16x1xf32, #tpu.memory_space<vmem>>, %arg7: memref<16x1xf32, #tpu.memory_space<vmem>>, %arg8: memref<16x1xf32, #tpu.memory_space<vmem>>, %arg9: memref<16x1xf32, #tpu.memory_space<vmem>>) attributes {dimension_semantics = [#tpu.dimension_semantics<parallel>, #tpu.dimension_semantics<arbitrary>], iteration_bounds = array<i64: 1, 1>, scalar_prefetch = 0 : i64, scratch_operands = 2 : i64, tpu.core_type = #tpu.core_type<tc>, window_params = [{transform_indices = @transform_0, window_bounds = array<i64: 16, 128>}, {transform_indices = @transform_1, window_bounds = array<i64: 16, 128>}, {transform_indices = @transform_2, window_bounds = array<i64: 16, 1>}, {transform_indices = @transform_3, window_bounds = array<i64: 16, 1>}, {transform_indices = @transform_4, window_bounds = array<i64: 16, 1>}, {transform_indices = @transform_5, window_bounds = array<i64: 16, 1>}]} {
    %c0_i32 = arith.constant 0 : i32
    %0 = arith.cmpi eq, %arg1, %c0_i32 : i32
    %1 = arith.extui %0 : i1 to i32
    %c0_i32_0 = arith.constant 0 : i32
    %2 = arith.cmpi ne, %1, %c0_i32_0 : i32
    scf.if %2 {
      %cst_17 = arith.constant 0xFF800000 : f32
      %33 = vector.broadcast %cst_17 : f32 to vector<16x1xf32>
      %c0_18 = arith.constant 0 : index
      %c0_19 = arith.constant 0 : index
      %34 = vector.load %arg8[%c0_18, %c0_19] : memref<16x1xf32, #tpu.memory_space<vmem>>, vector<16x1xf32>
      tpu.vector_store %arg8[%c0_18, %c0_19], %33 {strides = array<i32>} : memref<16x1xf32, #tpu.memory_space<vmem>>, vector<16x1xf32>,
      %cst_20 = arith.constant 0.000000e+00 : f32
      %35 = vector.broadcast %cst_20 : f32 to vector<16x1xf32>
      %c0_21 = arith.constant 0 : index
      %c0_22 = arith.constant 0 : index
      %36 = vector.load %arg9[%c0_21, %c0_22] : memref<16x1xf32, #tpu.memory_space<vmem>>, vector<16x1xf32>
      tpu.vector_store %arg9[%c0_21, %c0_22], %35 {strides = array<i32>} : memref<16x1xf32, #tpu.memory_space<vmem>>, vector<16x1xf32>,
    } else {
    }
    %c0 = arith.constant 0 : index
    %c0_1 = arith.constant 0 : index
    %3 = vector.load %arg2[%c0, %c0_1] : memref<16x128xbf16, #tpu.memory_space<vmem>>, vector<16x128xbf16>
    %c0_2 = arith.constant 0 : index
    %c0_3 = arith.constant 0 : index
    %4 = vector.load %arg3[%c0_2, %c0_3] : memref<16x128xbf16, #tpu.memory_space<vmem>>, vector<16x128xbf16>
    %cst = arith.constant dense<0.000000e+00> : vector<16x16xf32>
    %5 = tpu.matmul %3, %4, %cst {dimension_numbers = #tpu.dot_dimension_numbers<[1], [1], [0], [0], [0, 0, 1, 0], [], []>} : vector<16x128xbf16>, vector<16x128xbf16>, vector<16x16xf32> -> vector<16x16xf32>
    %cst_4 = arith.constant 14.2857122 : f32
    %6 = vector.broadcast %cst_4 : f32 to vector<16x16xf32>
    %7 = arith.mulf %5, %6 : vector<16x16xf32>
    %c0_5 = arith.constant 0 : index
    %c0_6 = arith.constant 0 : index
    %8 = vector.load %arg8[%c0_5, %c0_6] : memref<16x1xf32, #tpu.memory_space<vmem>>, vector<16x1xf32>
    %cst_7 = arith.constant dense<0xFF800000> : vector<16xf32>
    %9 = vector.multi_reduction <maximumf>, %7, %cst_7 [1] : vector<16x16xf32> to vector<16xf32>
    %10 = vector.shape_cast %9 : vector<16xf32> to vector<16x1xf32>
    %11 = arith.maximumf %8, %10 : vector<16x1xf32>
    %12 = vector.broadcast %11 : vector<16x1xf32> to vector<16x16xf32>
    %13 = arith.subf %7, %12 : vector<16x16xf32>
    %14 = math.exp %13 : vector<16x16xf32>
    %15 = arith.subf %8, %11 : vector<16x1xf32>
    %16 = math.exp %15 : vector<16x1xf32>
    %c16_i32 = arith.constant 16 : i32
    %17 = arith.muli %arg0, %c16_i32 : i32
    %c16_i32_8 = arith.constant 16 : i32
    %18 = arith.muli %arg1, %c16_i32_8 : i32
    %c16_i32_9 = arith.constant 16 : i32
    %19 = arith.addi %18, %c16_i32_9 : i32
    %20 = arith.cmpi slt, %17, %19 : i32
    %c16_i32_10 = arith.constant 16 : i32
    %21 = arith.addi %17, %c16_i32_10 : i32
    %22 = arith.cmpi slt, %18, %21 : i32
    %23 = arith.andi %20, %22 : i1
    %24 = arith.extui %23 : i1 to i32
    %c0_i32_11 = arith.constant 0 : i32
    %25 = arith.cmpi ne, %24, %c0_i32_11 : i32
    scf.if %25 {
      %33 = tpu.iota {dimensions = array<i32: 0>} : vector<16x16xi32>
      %34 = tpu.iota {dimensions = array<i32: 1>} : vector<16x16xi32>
      %35 = vector.broadcast %17 : i32 to vector<16x16xi32>
      %36 = arith.addi %33, %35 : vector<16x16xi32>
      %37 = vector.broadcast %18 : i32 to vector<16x16xi32>
      %38 = arith.addi %34, %37 : vector<16x16xi32>
      %39 = arith.cmpi ne, %36, %38 : vector<16x16xi32>
      %cst_17 = arith.constant 0.000000e+00 : f32
      %40 = vector.broadcast %cst_17 : f32 to vector<16x16xf32>
      %41 = arith.select %39, %14, %40 : vector<16x16xi1>, vector<16x16xf32>
      %cst_18 = arith.constant dense<0.000000e+00> : vector<16xf32>
      %42 = vector.multi_reduction <add>, %41, %cst_18 [1] : vector<16x16xf32> to vector<16xf32>
      %43 = vector.shape_cast %42 : vector<16xf32> to vector<16x1xf32>
      %c0_19 = arith.constant 0 : index
      %c0_20 = arith.constant 0 : index
      %44 = vector.load %arg9[%c0_19, %c0_20] : memref<16x1xf32, #tpu.memory_space<vmem>>, vector<16x1xf32>
      %45 = arith.mulf %16, %44 : vector<16x1xf32>
      %46 = arith.addf %45, %43 : vector<16x1xf32>
      %c0_21 = arith.constant 0 : index
      %c0_22 = arith.constant 0 : index
      %47 = vector.load %arg9[%c0_21, %c0_22] : memref<16x1xf32, #tpu.memory_space<vmem>>, vector<16x1xf32>
      tpu.vector_store %arg9[%c0_21, %c0_22], %46 {strides = array<i32>} : memref<16x1xf32, #tpu.memory_space<vmem>>, vector<16x1xf32>,
    } else {
    }
    %true = arith.constant true
    %26 = arith.xori %23, %true : i1
    %27 = arith.extui %26 : i1 to i32
    %c0_i32_12 = arith.constant 0 : i32
    %28 = arith.cmpi ne, %27, %c0_i32_12 : i32
    scf.if %28 {
      %c0_17 = arith.constant 0 : index
      %c0_18 = arith.constant 0 : index
      %33 = vector.load %arg9[%c0_17, %c0_18] : memref<16x1xf32, #tpu.memory_space<vmem>>, vector<16x1xf32>
      %34 = arith.mulf %16, %33 : vector<16x1xf32>
      %cst_19 = arith.constant dense<0.000000e+00> : vector<16xf32>
      %35 = vector.multi_reduction <add>, %14, %cst_19 [1] : vector<16x16xf32> to vector<16xf32>
      %36 = vector.shape_cast %35 : vector<16xf32> to vector<16x1xf32>
      %37 = arith.addf %34, %36 : vector<16x1xf32>
      %c0_20 = arith.constant 0 : index
      %c0_21 = arith.constant 0 : index
      %38 = vector.load %arg9[%c0_20, %c0_21] : memref<16x1xf32, #tpu.memory_space<vmem>>, vector<16x1xf32>
      tpu.vector_store %arg9[%c0_20, %c0_21], %37 {strides = array<i32>} : memref<16x1xf32, #tpu.memory_space<vmem>>, vector<16x1xf32>,
    } else {
    }
    %c0_13 = arith.constant 0 : index
    %c0_14 = arith.constant 0 : index
    %29 = vector.load %arg8[%c0_13, %c0_14] : memref<16x1xf32, #tpu.memory_space<vmem>>, vector<16x1xf32>
    tpu.vector_store %arg8[%c0_13, %c0_14], %11 {strides = array<i32>} : memref<16x1xf32, #tpu.memory_space<vmem>>, vector<16x1xf32>,
    %c0_i32_15 = arith.constant 0 : i32
    %30 = arith.cmpi eq, %arg1, %c0_i32_15 : i32
    %31 = arith.extui %30 : i1 to i32
    %c0_i32_16 = arith.constant 0 : i32
    %32 = arith.cmpi ne, %31, %c0_i32_16 : i32
    scf.if %32 {
      %c0_17 = arith.constant 0 : index
      %c0_18 = arith.constant 0 : index
      %33 = vector.load %arg8[%c0_17, %c0_18] : memref<16x1xf32, #tpu.memory_space<vmem>>, vector<16x1xf32>
      %c0_19 = arith.constant 0 : index
      %c0_20 = arith.constant 0 : index
      %34 = vector.load %arg9[%c0_19, %c0_20] : memref<16x1xf32, #tpu.memory_space<vmem>>, vector<16x1xf32>
      %cst_21 = arith.constant 9.99999993E-9 : f32
      %35 = vector.broadcast %cst_21 : f32 to vector<16x1xf32>
      %36 = arith.addf %34, %35 : vector<16x1xf32>
      %37 = math.log %36 : vector<16x1xf32>
      %38 = arith.addf %33, %37 : vector<16x1xf32>
      %c0_22 = arith.constant 0 : index
      %c0_23 = arith.constant 0 : index
      %39 = vector.load %arg4[%c0_22, %c0_23] : memref<16x1xf32, #tpu.memory_space<vmem>>, vector<16x1xf32>
      %c0_24 = arith.constant 0 : index
      %c0_25 = arith.constant 0 : index
      %40 = vector.load %arg5[%c0_24, %c0_25] : memref<16x1xf32, #tpu.memory_space<vmem>>, vector<16x1xf32>
      %41 = arith.mulf %38, %40 : vector<16x1xf32>
      %42 = arith.subf %39, %41 : vector<16x1xf32>
      %c0_26 = arith.constant 0 : index
      %c0_27 = arith.constant 0 : index
      %43 = vector.load %arg6[%c0_26, %c0_27] : memref<16x1xf32, #tpu.memory_space<vmem>>, vector<16x1xf32>
      %cst_28 = arith.constant 9.99999993E-9 : f32
      %44 = vector.broadcast %cst_28 : f32 to vector<16x1xf32>
      %45 = arith.addf %43, %44 : vector<16x1xf32>
      %46 = tpu.reciprocal %45 {approx = true} : vector<16x1xf32> -> vector<16x1xf32>
      %47 = arith.mulf %42, %46 : vector<16x1xf32>
      %cst_29 = arith.constant -1.000000e+00 : f32
      %48 = vector.broadcast %cst_29 : f32 to vector<16x1xf32>
      %49 = arith.mulf %48, %47 : vector<16x1xf32>
      %c0_30 = arith.constant 0 : index
      %c0_31 = arith.constant 0 : index
      %50 = vector.load %arg7[%c0_30, %c0_31] : memref<16x1xf32, #tpu.memory_space<vmem>>, vector<16x1xf32>
      tpu.vector_store %arg7[%c0_30, %c0_31], %49 {strides = array<i32>} : memref<16x1xf32, #tpu.memory_space<vmem>>, vector<16x1xf32>,
    } else {
    }
    return
  }
  func.func @transform_0(%arg0: i32, %arg1: i32) -> (i32, i32) {
    %c0_i32 = arith.constant 0 : i32
    %c0_i32_0 = arith.constant 0 : i32
    return %arg0, %c0_i32 : i32, i32
  }
  func.func @transform_1(%arg0: i32, %arg1: i32) -> (i32, i32) {
    %c0_i32 = arith.constant 0 : i32
    %c0_i32_0 = arith.constant 0 : i32
    return %arg1, %c0_i32 : i32, i32
  }
  func.func @transform_2(%arg0: i32, %arg1: i32) -> (i32, i32) {
    %c0_i32 = arith.constant 0 : i32
    %c0_i32_0 = arith.constant 0 : i32
    return %arg0, %c0_i32 : i32, i32
  }
  func.func @transform_3(%arg0: i32, %arg1: i32) -> (i32, i32) {
    %c0_i32 = arith.constant 0 : i32
    %c0_i32_0 = arith.constant 0 : i32
    return %arg0, %c0_i32 : i32, i32
  }
  func.func @transform_4(%arg0: i32, %arg1: i32) -> (i32, i32) {
    %c0_i32 = arith.constant 0 : i32
    %c0_i32_0 = arith.constant 0 : i32
    return %arg0, %c0_i32 : i32, i32
  }
  func.func @transform_5(%arg0: i32, %arg1: i32) -> (i32, i32) {
    %c0_i32 = arith.constant 0 : i32
    %c0_i32_0 = arith.constant 0 : i32
    return %arg0, %c0_i32 : i32, i32
  }
}

</mosaic_0001>

<bundles_post_ra>
// kernel: tpu_custom_call.1
= control target key start
LH: loop header
LB: loop body
LE: loop exit
PB: predicated region body
PF: predicated region fallthrough
CT: control target
= control target key end

     0   :  { %vm25_vm0 = vcmask 7168   ;;  %v255_v0 = vmov 0.0   ;;  %vm256_vm1 = vmmov 0   ;;  %v257_v3 = vmov -inf   ;;  %s333_s1 = inlined_call_operand.vmem [shape: bf16[16,128], index: 1, kind: input, shape index: {}]   ;;  %s334_s0 = inlined_call_operand.vmem [shape: bf16[16,128], index: 0, kind: input, shape index: {}]   ;;  %s335_s4 = inlined_call_operand.vmem [shape: f32[16,1], index: 4, kind: input, shape index: {}]   ;;  %s336_s3 = inlined_call_operand.vmem [shape: f32[16,1], index: 3, kind: input, shape index: {}]   ;;  %s337_s2 = inlined_call_operand.vmem [shape: f32[16,1], index: 2, kind: input, shape index: {}]   ;;  %s338_s5 = inlined_call_operand.vmem [shape: f32[16,1], index: 5, kind: output, shape index: {}]  }
   0x1   :  { %28 = vst.msk [vmem:[#allocation3] sm:$0xff] %vm25_vm0, %v255_v0  ;;  %29 = vst.msk [vmem:[#allocation3 + $0x8] sm:$0xff] %vm25_vm0, %v255_v0  ;;  %225 = vmatprep.subr.bf16.mxu0 %v255_v0  ;;  %v237_v1 = vld [vmem:[%s333_s1] sm:$0xff]   ;;  %227 = vmatprep.mubr.msk.bf16.mxu0 %vm256_vm1, %v255_v0  ;;  %vm91_vm2 = vcmask 130048   ;;  %v258_v12 = vmov 0   ;;  %v132_v26 = vlaneseq  ;;  %v206_v55 = vld [vmem:[%s335_s4 + $0x8] sm:$0xff] }
   0x2   :  { %226 = vmatpush3.bf16.xpose.msra.mxu0 %v237_v1  ;;  %v238_v2 = vld [vmem:[%s334_s0] sm:$0xff]   ;;  %26 = vst.msk [vmem:[#allocation2] sm:$0xff] %vm25_vm0, %v257_v3  ;;  %27 = vst.msk [vmem:[#allocation2 + $0x8] sm:$0xff] %vm25_vm0, %v257_v3  ;;  %235 = vset.pattern.permute.xlu1 %v258_v12  ;;  %v208_v56 = vadd.f32 1e-08, %v206_v55 }
   0x3   :  { %236 = vset.pattern.permute.xlu0 %v258_v12  ;;  %v133_v28 = vshrl.u32 %v132_v26, 7  ;;  %v136_v29 = vand.u32 127, %v132_v26  ;;  %v205_v51 = vld [vmem:[%s335_s4] sm:$0xff] }
   0x4   :  { %v207_v53 = vadd.f32 1e-08, %v205_v51  ;;  %v199_v60 = vld [vmem:[%s336_s3] sm:$0xff] }
   0x5   :  { %vm142_vm3 = vcmp.ne.s32.totalorder %v133_v28, %v136_v29  ;;  %v134_v30 = vadd.s32 8, %v133_v28  ;;  %v197_v63 = vld [vmem:[%s337_s2] sm:$0xff] }
   0x7   :  { %vm143_vm4 = vcmp.ne.s32.totalorder %v134_v30, %v136_v29 }
   0x8   :  { %v152_v40 = vld [vmem:[#allocation3] sm:$0xff]  ;;  %v153_v44 = vld [vmem:[#allocation3 + $0x8] sm:$0xff] }
   0x9   :  { %228 = vmatmul.mubr.bf16.vlgmr.msra.gmra.mrb[0].mxu0 %v238_v2  ;;  %v89_v13 = vld [vmem:[#allocation2] sm:$0xff]  ;;  %v90_v16 = vld [vmem:[#allocation2 + $0x8] sm:$0xff] }
  0xdc   :  { %v80_v4 = vpop.f32.mrb[0].mxu0 }
  0xdd   :  { %v87_v5 = vmul.f32 14.285712, %v80_v4  ;;  %v229_v6 = vpop.f32.mrb[1].mxu0  ;;  %v200_v4 = vld [vmem:[%s336_s3 + $0x8] sm:$0xff] }
  0xde   :  { %v83_v7 = vpop.f32.mrb[2].mxu0 }
  0xdf   :  { %v88_v8 = vmul.f32 14.285712, %v83_v7  ;;  %v230_v9 = vpop.f32.mrb[3].mxu0  ;;  %v92_v10 = vsel %vm91_vm2, %v87_v5, -inf  ;;  %v198_v7 = vld [vmem:[%s337_s2 + $0x8] sm:$0xff] }
  0xe0   :  { %93 = vmax.xlane.f32.xlu0 %v92_v10 }
  0xe1   :  { %v95_v11 = vsel %vm91_vm2, %v88_v8, -inf }
  0xe4   :  { %96 = vmax.xlane.f32.xlu0 %v95_v11 }
 0x16d   :  { %v94_v14 = vpop.xlane.xlu0 %93 }
 0x16e   :  { %v98_v15 = vmax.f32 %v89_v13, %v94_v14 }
 0x170   :  { %v116_v17 = vsub.f32 %v89_v13, %v98_v15  ;;  %180 = vst.msk [vmem:[#allocation2] sm:$0xff] %vm25_vm0, %v98_v15  ;;  %102 = vperm.xlu1 %235, %v98_v15  }
 0x171   :  { %v97_v18 = vpop.xlane.xlu0 %96 }
 0x172   :  { %v99_v19 = vmax.f32 %v90_v16, %v97_v18  ;;  %v118_v37 = vmul.f32 1.442695, %v116_v17 }
 0x174   :  { %v117_v20 = vsub.f32 %v90_v16, %v99_v19  ;;  %181 = vst.msk [vmem:[#allocation2 + $0x8] sm:$0xff] %vm25_vm0, %v99_v19  ;;  %107 = vperm.xlu1 %235, %v99_v19  }
 0x176   :  { %v120_v38 = vmul.f32 1.442695, %v117_v20 }
 0x177   :  { %v185_v59 = vld [vmem:[#allocation2] sm:$0xff] }
 0x17b   :  { %v186_v3 = vld [vmem:[#allocation2 + $0x8] sm:$0xff] }
 0x1ef   :  { %v103_v21 = vpop.permute.xlu1 %102 }
 0x1f0   :  { %v110_v22 = vsub.f32 %v87_v5, %v103_v21 }
 0x1f2   :  { %v112_v23 = vmul.f32 1.442695, %v110_v22 }
 0x1f3   :  { %v108_v24 = vpop.permute.xlu1 %107 }
 0x1f4   :  { %239 = vpow2.f32 %v112_v23  ;;  %v111_v25 = vsub.f32 %v88_v8, %v108_v24 }
 0x1f6   :  { %v114_v27 = vmul.f32 1.442695, %v111_v25 }
 0x1f8   :  { %241 = vpow2.f32 %v114_v27 }
 0x1f9   :  { %243 = vpow2.f32 %v118_v37 }
 0x1fa   :  { %245 = vpow2.f32 %v120_v38 }
 0x1fe   :  { %v240_v31 = vpop.eup %239 }
 0x1ff   :  { %v144_v32 = vsel %vm142_vm3, %v240_v31, 0.0 }
 0x200   :  { %v146_v33 = vsel %vm91_vm2, %v144_v32, 0.0 }
 0x201   :  { %147 = vadd.xlane.f32.xlu0 %v146_v33 }
 0x202   :  { %v242_v34 = vpop.eup %241 }
 0x203   :  { %v145_v35 = vsel %vm143_vm4, %v242_v34, 0.0  ;;  %v244_v39 = vpop.eup %243 }
 0x204   :  { %v149_v36 = vsel %vm91_vm2, %v145_v35, 0.0  ;;  %v154_v41 = vmul.f32 %v244_v39, %v152_v40  ;;  %v246_v42 = vpop.eup %245 }
 0x205   :  { %150 = vadd.xlane.f32.xlu1 %v149_v36  ;;  %v155_v46 = vmul.f32 %v246_v42, %v153_v44 }
 0x28e   :  { %v148_v43 = vpop.xlane.xlu0 %147 }
 0x28f   :  { %v156_v45 = vadd.f32 %v154_v41, %v148_v43 }
 0x291   :  { %159 = vst.msk [vmem:[#allocation3] sm:$0xff] %vm25_vm0, %v156_v45 }
 0x292   :  { %v151_v47 = vpop.xlane.xlu1 %150 }
 0x293   :  { %v157_v48 = vadd.f32 %v155_v46, %v151_v47 }
 0x295   :  { %160 = vst.msk [vmem:[#allocation3 + $0x8] sm:$0xff] %vm25_vm0, %v157_v48 }
 0x298   :  { %v187_v49 = vld [vmem:[#allocation3] sm:$0xff] }
 0x299   :  { %v189_v50 = vadd.f32 1e-08, %v187_v49 }
 0x29b   :  { %247 = vlog2.f32 %v189_v50 }
 0x29c   :  { %v188_v52 = vld [vmem:[#allocation3 + $0x8] sm:$0xff] }
 0x29d   :  { %v190_v54 = vadd.f32 1e-08, %v188_v52 }
 0x29f   :  { %249 = vlog2.f32 %v190_v54 }
 0x2a0   :  { %251 = vrcp.f32 %v207_v53 }
 0x2a1   :  { %253 = vrcp.f32 %v208_v56 }
 0x2a5   :  { %v248_v57 = vpop.eup %247 }
 0x2a6   :  { %v192_v58 = vmul.f32 0.6931472, %v248_v57 }
 0x2a8   :  { %v195_v61 = vadd.f32 %v192_v58, %v185_v59 }
 0x2a9   :  { %v250_v62 = vpop.eup %249 }
 0x2aa   :  { %v201_v0 = vmul.f32 %v199_v60, %v195_v61  ;;  %v194_v1 = vmul.f32 0.6931472, %v250_v62  ;;  %v252_v2 = vpop.eup %251 }
 0x2ab   :  { %v254_v10 = vpop.eup %253 }
 0x2ac   :  { %v203_v5 = vsub.f32 %v197_v63, %v201_v0  ;;  %v196_v6 = vadd.f32 %v194_v1, %v186_v3 }
 0x2ae   :  { %v211_v8 = vmul.f32 %v252_v2, %v203_v5  ;;  %v202_v9 = vmul.f32 %v200_v4, %v196_v6 }
 0x2b0   :  { %v213_v11 = vmul.f32 -1.0, %v211_v8  ;;  %v204_v12 = vsub.f32 %v198_v7, %v202_v9 }
 0x2b2   :  { %215 = vst.msk [vmem:[%s338_s5] sm:$0xff] %vm25_vm0, %v213_v11  ;;  %v212_v13 = vmul.f32 %v254_v10, %v204_v12 }
 0x2b4   :  { %v214_v14 = vmul.f32 -1.0, %v212_v13 }
 0x2b6   :  { %216 = vst.msk [vmem:[%s338_s5 + $0x8] sm:$0xff] %vm25_vm0, %v214_v14 }

</bundles_post_ra>
